<compile_context>
chip_gen: v5e
topology: v5e:2x2
jax: 0.10.0
libtpu: 0.0.40
codegen_flags: <defaults>
</compile_context>

<pallas_src>
import functools

import jax
import jax.numpy as jnp
from jax import lax
from jax.experimental import pallas as pl
from jax.experimental.pallas import tpu as pltpu


_LANES = 128
_SUBLANES = 8
_MAX_TILE_ROWS = 1024  # (1024, 128) f32 tile = 512 KiB -> well under VMEM on v5e/v6e/v7x


def _elementwise_loss(pred, targ, loss_type):
    diff = pred - targ
    if loss_type == "l1":
        return jnp.abs(diff)
    elif loss_type == "l2":
        return diff * diff
    elif loss_type == "smooth_l1":
        ad = jnp.abs(diff)
        return jnp.where(ad < 1.0, 0.5 * diff * diff, ad - 0.5)
    else:
        raise ValueError(f"Unsupported loss type: {loss_type}")


def _depth_loss_sum_kernel(pred_ref, targ_ref, acc_ref, *,
                           loss_type, ignore_value, tile_rows, valid_rows,
                           tiles_per_core):
    c = pl.program_id(0)   # "core" split axis (parallel)
    i = pl.program_id(1)   # reduction axis (arbitrary)

    @pl.when(i == 0)
    def _():
        acc_ref[...] = jnp.zeros_like(acc_ref)

    t_raw = targ_ref[...]
    p = pred_ref[...].astype(jnp.float32)
    t = t_raw.astype(jnp.float32)

    # Row-validity mask: rows beyond the true array extent (partial last block, or the
    # clamped duplicate block the second core may see) contribute nothing.
    logical_tile = c * tiles_per_core + i
    row0 = logical_tile * tile_rows
    row_ids = row0 + lax.broadcasted_iota(jnp.int32, (tile_rows, _LANES), 0)
    valid = row_ids < valid_rows

    # Mask is computed on the ORIGINAL target dtype (matches torch `targets != ignore`).
    mask = jnp.logical_and(t_raw != ignore_value, valid)
    loss = jnp.where(mask, _elementwise_loss(p, t, loss_type), 0.0)
    maskf = mask.astype(jnp.float32)

    # Partial-reduce the tile down to one (8,128) vreg per quantity: pure VPU adds.
    # The single expensive cross-lane reduction is done once, in the wrapper.
    loss8 = loss.reshape(-1, _SUBLANES, _LANES).sum(axis=0)
    mask8 = maskf.reshape(-1, _SUBLANES, _LANES).sum(axis=0)
    acc_ref[0, 0] += loss8
    acc_ref[0, 1] += mask8


def _depth_loss_none_kernel(pred_ref, targ_ref, out_ref, *, loss_type, ignore_value):
    t_raw = targ_ref[...]
    p = pred_ref[...].astype(jnp.float32)
    t = t_raw.astype(jnp.float32)
    mask = (t_raw != ignore_value).astype(jnp.float32)
    out_ref[...] = _elementwise_loss(p, t, loss_type) * mask


def _as_lanes(pred, targ, ignore_value):
    """Flatten to a lane-dense (rows, 128) view in the ORIGINAL dtype.

    Only pads (i.e. materializes a copy) when the element count is not a multiple of
    8*128; otherwise it is a free row-major reshape. Padded targets get ignore_value so
    padded elements are masked out.
    """
    total = pred.size
    chunk = _SUBLANES * _LANES
    pflat = pred.reshape(-1)
    tflat = targ.reshape(-1)
    if total % chunk != 0:
        pad = chunk - total % chunk
        pflat = jnp.pad(pflat, (0, pad))
        tflat = jnp.pad(tflat, (0, pad), constant_values=ignore_value)
    rows = pflat.size // _LANES
    return pflat.reshape(rows, _LANES), tflat.reshape(rows, _LANES), rows


def depth_loss(predictions, targets, *, loss_type="l1", reduction="mean",
               ignore_value=0.0):
    """JAX/Pallas equivalent of DepthLoss.forward."""
    if reduction not in ("mean", "sum", "none"):
        raise ValueError(f"Unsupported reduction: {reduction}")
    # validate loss_type eagerly (matches module __init__)
    _ = _elementwise_loss(jnp.float32(0.0), jnp.float32(0.0), loss_type)

    p2d, t2d, rows = _as_lanes(predictions, targets, ignore_value)
    tile_rows = min(_MAX_TILE_ROWS, rows)      # rows is always a multiple of 8
    n_tiles = pl.cdiv(rows, tile_rows)

    if reduction == "none":
        kern = functools.partial(_depth_loss_none_kernel,
                                 loss_type=loss_type, ignore_value=ignore_value)
        out = pl.pallas_call(
            kern,
            out_shape=jax.ShapeDtypeStruct((rows, _LANES), jnp.float32),
            grid_spec=pltpu.PrefetchScalarGridSpec(
                num_scalar_prefetch=0,
                grid=(n_tiles,),
                in_specs=[pl.BlockSpec((tile_rows, _LANES), lambda i: (i, 0)),
                          pl.BlockSpec((tile_rows, _LANES), lambda i: (i, 0))],
                out_specs=pl.BlockSpec((tile_rows, _LANES), lambda i: (i, 0)),
            ),
            compiler_params=pltpu.CompilerParams(
                dimension_semantics=("parallel",)),
        )(p2d, t2d)
        return out.reshape(-1)[: predictions.size].reshape(predictions.shape)

    # mean / sum path: per-core resident vector accumulators, final reduce in wrapper.
    n_cores = 2
    tiles_per_core = pl.cdiv(n_tiles, n_cores)

    def in_map(c, i):
        # clamp so the second core never DMAs past the array; the in-kernel
        # row-validity mask zeroes any duplicated/overhanging contribution.
        return (jnp.minimum(c * tiles_per_core + i, n_tiles - 1), 0)

    kern = functools.partial(_depth_loss_sum_kernel,
                             loss_type=loss_type, ignore_value=ignore_value,
                             tile_rows=tile_rows, valid_rows=rows,
                             tiles_per_core=tiles_per_core)
    acc = pl.pallas_call(
        kern,
        out_shape=jax.ShapeDtypeStruct((n_cores, 2, _SUBLANES, _LANES), jnp.float32),
        grid_spec=pltpu.PrefetchScalarGridSpec(
            num_scalar_prefetch=0,
            grid=(n_cores, tiles_per_core),
            in_specs=[pl.BlockSpec((tile_rows, _LANES), in_map),
                      pl.BlockSpec((tile_rows, _LANES), in_map)],
            out_specs=pl.BlockSpec((1, 2, _SUBLANES, _LANES),
                                   lambda c, i: (c, 0, 0, 0)),
        ),
        compiler_params=pltpu.CompilerParams(
            dimension_semantics=("parallel", "arbitrary")),
    )(p2d, t2d)

    lsum = acc[:, 0].sum()
    msum = acc[:, 1].sum()
    if reduction == "mean":
        return lsum / (msum + 1e-8)
    return lsum


def _reference(pred, targ, loss_type, reduction, ignore_value):
    pred = pred.astype(jnp.float32)
    targ = targ.astype(jnp.float32)
    mask = (targ != ignore_value).astype(jnp.float32)
    loss = _elementwise_loss(pred, targ, loss_type) * mask
    if reduction == "mean":
        return loss.sum() / (mask.sum() + 1e-8)
    elif reduction == "sum":
        return loss.sum()
    return loss


if __name__ == "__main__":
    key = jax.random.PRNGKey(0)
    k1, k2, k3 = jax.random.split(key, 3)

    # Small NCHW depth maps: batch=2, channels=4, spatial=16x16
    shape = (2, 4, 16, 16)
    predictions = jax.random.normal(k1, shape, dtype=jnp.float32)
    targets = jax.random.normal(k2, shape, dtype=jnp.float32)
    # sprinkle ignore_value (0.0) pixels into the targets
    drop = jax.random.uniform(k3, shape) < 0.3
    targets = jnp.where(drop, 0.0, targets)

    ok = True
    for loss_type in ("l1", "l2", "smooth_l1"):
        for reduction in ("mean", "sum", "none"):
            out = depth_loss(predictions, targets,
                             loss_type=loss_type, reduction=reduction,
                             ignore_value=0.0)
            out = jax.block_until_ready(out)
            ref = _reference(predictions, targets, loss_type, reduction, 0.0)
            if not jnp.allclose(out, ref, rtol=1e-5, atol=1e-5):
                ok = False

    if ok:
        print("KERNEL_OK")
    else:
        print("KERNEL_MISMATCH")
</pallas_src>

<mosaic_0001>
module attributes {stable_mosaic.version = 11 : i64} {
  func.func @_depth_loss_sum_kernel(%arg0: i32, %arg1: i32, %arg2: memref<16x128xf32, #tpu.memory_space<vmem>>, %arg3: memref<16x128xf32, #tpu.memory_space<vmem>>, %arg4: memref<1x2x8x128xf32, #tpu.memory_space<vmem>>) attributes {dimension_semantics = [#tpu.dimension_semantics<parallel>, #tpu.dimension_semantics<arbitrary>], iteration_bounds = array<i64: 2, 1>, scalar_prefetch = 0 : i64, scratch_operands = 0 : i64, tpu.core_type = #tpu.core_type<tc>, window_params = [{transform_indices = @transform_0, window_bounds = array<i64: 16, 128>}, {transform_indices = @transform_1, window_bounds = array<i64: 16, 128>}, {transform_indices = @transform_2, window_bounds = array<i64: 1, 2, 8, 128>}]} {
    %c0_i32 = arith.constant 0 : i32
    %0 = arith.cmpi eq, %arg1, %c0_i32 : i32
    %1 = arith.extui %0 : i1 to i32
    %c0_i32_0 = arith.constant 0 : i32
    %2 = arith.cmpi ne, %1, %c0_i32_0 : i32
    scf.if %2 {
      %cst_23 = arith.constant 0.000000e+00 : f32
      %38 = vector.broadcast %cst_23 : f32 to vector<1x2x8x128xf32>
      %c0_24 = arith.constant 0 : index
      %c0_25 = arith.constant 0 : index
      %c0_26 = arith.constant 0 : index
      %c0_27 = arith.constant 0 : index
      %39 = vector.load %arg4[%c0_24, %c0_25, %c0_26, %c0_27] : memref<1x2x8x128xf32, #tpu.memory_space<vmem>>, vector<1x2x8x128xf32>
      tpu.vector_store %arg4[%c0_24, %c0_25, %c0_26, %c0_27], %38 {strides = array<i32>} : memref<1x2x8x128xf32, #tpu.memory_space<vmem>>, vector<1x2x8x128xf32>,
    } else {
    }
    %c0 = arith.constant 0 : index
    %c0_1 = arith.constant 0 : index
    %3 = vector.load %arg3[%c0, %c0_1] : memref<16x128xf32, #tpu.memory_space<vmem>>, vector<16x128xf32>
    %c0_2 = arith.constant 0 : index
    %c0_3 = arith.constant 0 : index
    %4 = vector.load %arg2[%c0_2, %c0_3] : memref<16x128xf32, #tpu.memory_space<vmem>>, vector<16x128xf32>
    %c1_i32 = arith.constant 1 : i32
    %5 = arith.muli %arg0, %c1_i32 : i32
    %6 = arith.addi %5, %arg1 : i32
    %c16_i32 = arith.constant 16 : i32
    %7 = arith.muli %6, %c16_i32 : i32
    %8 = tpu.iota {dimensions = array<i32: 0>} : vector<16x128xi32>
    %9 = vector.broadcast %7 : i32 to vector<16x128xi32>
    %10 = arith.addi %9, %8 : vector<16x128xi32>
    %c16_i32_4 = arith.constant 16 : i32
    %11 = vector.broadcast %c16_i32_4 : i32 to vector<16x128xi32>
    %12 = arith.cmpi slt, %10, %11 : vector<16x128xi32>
    %cst = arith.constant 0.000000e+00 : f32
    %13 = vector.broadcast %cst : f32 to vector<16x128xf32>
    %14 = arith.cmpf one, %3, %13 : vector<16x128xf32>
    %15 = arith.andi %14, %12 : vector<16x128xi1>
    %16 = arith.subf %4, %3 : vector<16x128xf32>
    %17 = math.absf %16 : vector<16x128xf32>
    %cst_5 = arith.constant 0.000000e+00 : f32
    %18 = vector.broadcast %cst_5 : f32 to vector<16x128xf32>
    %19 = arith.select %15, %17, %18 : vector<16x128xi1>, vector<16x128xf32>
    %20 = arith.extui %15 : vector<16x128xi1> to vector<16x128xi32>
    %21 = arith.sitofp %20 : vector<16x128xi32> to vector<16x128xf32>
    %22 = vector.shape_cast %19 : vector<16x128xf32> to vector<2x8x128xf32>
    %cst_6 = arith.constant dense<0.000000e+00> : vector<8x128xf32>
    %23 = vector.multi_reduction <add>, %22, %cst_6 [0] : vector<2x8x128xf32> to vector<8x128xf32>
    %24 = vector.shape_cast %21 : vector<16x128xf32> to vector<2x8x128xf32>
    %cst_7 = arith.constant dense<0.000000e+00> : vector<8x128xf32>
    %25 = vector.multi_reduction <add>, %24, %cst_7 [0] : vector<2x8x128xf32> to vector<8x128xf32>
    %c0_8 = arith.constant 0 : index
    %c0_9 = arith.constant 0 : index
    %c0_10 = arith.constant 0 : index
    %c0_11 = arith.constant 0 : index
    %26 = vector.load %arg4[%c0_8, %c0_9, %c0_10, %c0_11] : memref<1x2x8x128xf32, #tpu.memory_space<vmem>>, vector<1x1x8x128xf32>
    %27 = vector.shape_cast %26 : vector<1x1x8x128xf32> to vector<8x128xf32>
    %28 = arith.addf %27, %23 : vector<8x128xf32>
    %c0_12 = arith.constant 0 : index
    %c0_13 = arith.constant 0 : index
    %c0_14 = arith.constant 0 : index
    %c0_15 = arith.constant 0 : index
    %29 = vector.load %arg4[%c0_12, %c0_13, %c0_14, %c0_15] : memref<1x2x8x128xf32, #tpu.memory_space<vmem>>, vector<1x1x8x128xf32>
    %30 = vector.shape_cast %29 : vector<1x1x8x128xf32> to vector<8x128xf32>
    %31 = vector.shape_cast %28 : vector<8x128xf32> to vector<1x1x8x128xf32>
    tpu.vector_store %arg4[%c0_12, %c0_13, %c0_14, %c0_15], %31 {strides = array<i32>} : memref<1x2x8x128xf32, #tpu.memory_space<vmem>>, vector<1x1x8x128xf32>,
    %c0_16 = arith.constant 0 : index
    %c1 = arith.constant 1 : index
    %c0_17 = arith.constant 0 : index
    %c0_18 = arith.constant 0 : index
    %32 = vector.load %arg4[%c0_16, %c1, %c0_17, %c0_18] : memref<1x2x8x128xf32, #tpu.memory_space<vmem>>, vector<1x1x8x128xf32>
    %33 = vector.shape_cast %32 : vector<1x1x8x128xf32> to vector<8x128xf32>
    %34 = arith.addf %33, %25 : vector<8x128xf32>
    %c0_19 = arith.constant 0 : index
    %c1_20 = arith.constant 1 : index
    %c0_21 = arith.constant 0 : index
    %c0_22 = arith.constant 0 : index
    %35 = vector.load %arg4[%c0_19, %c1_20, %c0_21, %c0_22] : memref<1x2x8x128xf32, #tpu.memory_space<vmem>>, vector<1x1x8x128xf32>
    %36 = vector.shape_cast %35 : vector<1x1x8x128xf32> to vector<8x128xf32>
    %37 = vector.shape_cast %34 : vector<8x128xf32> to vector<1x1x8x128xf32>
    tpu.vector_store %arg4[%c0_19, %c1_20, %c0_21, %c0_22], %37 {strides = array<i32>} : memref<1x2x8x128xf32, #tpu.memory_space<vmem>>, vector<1x1x8x128xf32>,
    return
  }
  func.func @transform_0(%arg0: i32, %arg1: i32) -> (i32, i32) {
    %c1_i32 = arith.constant 1 : i32
    %0 = arith.muli %arg0, %c1_i32 : i32
    %1 = arith.addi %0, %arg1 : i32
    %c0_i32 = arith.constant 0 : i32
    %2 = arith.minsi %1, %c0_i32 : i32
    %c0_i32_0 = arith.constant 0 : i32
    %c0_i32_1 = arith.constant 0 : i32
    return %2, %c0_i32_0 : i32, i32
  }
  func.func @transform_1(%arg0: i32, %arg1: i32) -> (i32, i32) {
    %c1_i32 = arith.constant 1 : i32
    %0 = arith.muli %arg0, %c1_i32 : i32
    %1 = arith.addi %0, %arg1 : i32
    %c0_i32 = arith.constant 0 : i32
    %2 = arith.minsi %1, %c0_i32 : i32
    %c0_i32_0 = arith.constant 0 : i32
    %c0_i32_1 = arith.constant 0 : i32
    return %2, %c0_i32_0 : i32, i32
  }
  func.func @transform_2(%arg0: i32, %arg1: i32) -> (i32, i32, i32, i32) {
    %c0_i32 = arith.constant 0 : i32
    %c0_i32_0 = arith.constant 0 : i32
    %c0_i32_1 = arith.constant 0 : i32
    %c0_i32_2 = arith.constant 0 : i32
    return %arg0, %c0_i32, %c0_i32_0, %c0_i32_1 : i32, i32, i32, i32
  }
}

</mosaic_0001>

<bundles_post_ra>
// kernel: tpu_custom_call.1
= control target key start
LH: loop header
LB: loop body
LE: loop exit
PB: predicated region body
PF: predicated region fallthrough
CT: control target
= control target key end

     0   :  { %7 = vsyncpa [#allocation3], 0  ;;  %s893_s0 = inlined_call_operand.hbm [shape: f32[16,128], index: 0, kind: input, shape index: {}]   ;;  %s894_s1 = inlined_call_operand.hbm [shape: f32[16,128], index: 1, kind: input, shape index: {}]   ;;  %s895_s2 = inlined_call_operand.hbm [shape: f32[2,2,8,128], index: 2, kind: output, shape index: {}]  }
   0x1   :  { %9 = vsyncpa [#allocation3 + $0x1], 0 }
   0x2   :  { %10 = vsyncpa [#allocation6], 0 }
   0x3   :  { %12 = vsyncpa [#allocation6 + $0x1], 0 }
   0x4   :  { %13 = vsyncpa [#allocation4], 0 }
   0x5   :  { %15 = vsyncpa [#allocation4 + $0x1], 0  ;;  %s721_s9 = smov 0   ;;  %s723_s10 = smov 0  }
   0x6   :  { %s725_s11 = smov 0   ;;  %s727_s12 = smov 0  }
   0x7   :  { %s729_s13 = smov 0   ;;  %s731_s14 = smov 0  }
   0x8   :  { %s733_s15 = smov 0   ;;  %s735_s16 = smov 0  }
   0x9 LB: > { %s407_s17 = sadd.s32 4294967295, %s697_s16   ;;  %s408_s18 = sadd.s32 4294967294, %s697_s16   ;;  %s697_s16 = sphi %s735_s16, %s21_s16   ;;  %s693_s15 = sphi %s733_s15, %s907_s15   ;;  %s689_s14 = sphi %s731_s14, %s906_s14   ;;  %s685_s13 = sphi %s729_s13, %s883_s13   ;;  %s681_s12 = sphi %s727_s12, %s905_s12   ;;  %s677_s11 = sphi %s725_s11, %s904_s11   ;;  %s673_s10 = sphi %s723_s10, %s903_s10   ;;  %s669_s9 = sphi %s721_s9, %s902_s9  }
   0xa   : > { %s33_s19 = sadd.s32 1, %s693_s15  ;;  %p666_p1 = scmp.ne.s32.totalorder %s685_s13, 0 }
   0xb   : > { %p35_p0 = scmp.ge.s32.totalorder %s33_s19, 2  ;;  %p54_p2 = scmp.eq.s32.totalorder %s697_s16, 0 }
   0xc   : > { %p59_p3 = scmp.ne.s32.totalorder %s685_s13, %s681_s12  ;;  %p60_p5 = scmp.eq.s32.totalorder %s407_s17, 0 }
   0xd   : > { %s909_s19 = smov (%p35_p0, %s33_s19), 0  ;;  %p767_p4 = por %p666_p1, %p54_p2 }
   0xe   : > { %p771_p6 = por %p60_p5, %p59_p3  ;;  %s101_s22 = ssub.s32 %s693_s15, %s909_s19 }
   0xf   : > { %p102_p7 = scmp.eq.s32.totalorder %s101_s22, 0  ;;  %s104_s23 = sadd.s32 1, %s677_s11 }
  0x10   : > { %p114_p8 = scmp.ne.s32.totalorder %s677_s11, %s673_s10  ;;  %p115_p9 = scmp.eq.s32.totalorder %s407_s17, 1 }
  0x11   : > { %s779_s24 = scalar_select %p102_p7, %s677_s11, %s104_s23  }
  0x12   : > { %p120_p10 = scmp.ne.s32.totalorder %s673_s10, %s669_s9  ;;  %p121_p11 = scmp.eq.s32.totalorder %s408_s18, 1 }
  0x13   : > { %p785_p12 = por %p115_p9, %p114_p8  ;;  %p410_p13 = scmp.ge.s32.totalorder %s697_s16, 2 }
  0x14   : > { %p790_p0 = por %p121_p11, %p120_p10  ;;  %p451_p1 = scmp.lt.s32.totalorder %s697_s16, 2 }
  0x15   : > { %s154_s29 = sshll.u32 %s893_s0, 4  ;;  %s699_s30 = smov [#allocation2]   ;;  %s155_s29 = int_to_ptr.hbm [resolvable:$true] %s154_s29 }
  0x16   : > { %s156_s3 = sshll.u32 %s699_s30, 4  ;;  %p800_p2 = pnand %p451_p1, %p767_p4  ;;  %s157_s3 = int_to_ptr.vmem [resolvable:$true] %s156_s3 }
  0x17   : > { %p417_p3 = scmp.ge.s32.totalorder %s697_s16, 1  ;;  %p189_p5 = scmp.lt.s32.totalorder %s697_s16, 3 }
  0x18   : > { %s530_s5 = sshra.s32 %s155_s29, 4  ;;  %p534_p8 = pneg %p800_p2  ;;  %s531_s5 = int_to_ptr.hbm [resolvable:$true] %s530_s5 }
  0x19   : > { %s532_s6 = scalar_lea.hbm %s531_s5, 16  ;;  %s537_s12 = scalar_lea.hbm %s893_s0, 16 }
  0x1a   : > { %p533_p7 = scmp.ne.s32.totalorder %s531_s5, %s532_s6  ;;  %p539_p4 = scmp.lt.s32.totalorder %s537_s12, %s532_s6 }
  0x1c   : > { %p535_p9 = pnand %p534_p8, %p533_p7 }
  0x1e   : > { %p536_p10 = pneg %p535_p9 }
  0x20   : > { %p541_p11 = pnand %p539_p4, %p536_p10 }
  0x22   : > { %544 = shalt.err (!%p541_p11)
}
  0x23   : > { %s700_s17 = smov 128   ;;  %s701_s18 = smov 8  }
  0x24   : > { %443 = dma.hbm_to_vmem [thread:$0]  (!%p800_p2), %s155_s29, 256, %s157_s3, [#allocation3], %s700_s17, %s700_s17, %s701_s18  }
  0x25   : > { %p820_p1 = pnand %p417_p3, %p189_p5  ;;  %s179_s27 = sshll.u32 %s894_s1, 4  ;;  %s180_s27 = int_to_ptr.hbm [resolvable:$true] %s179_s27 }
  0x26   : > { %s702_s28 = smov [#allocation5]   ;;  %s560_s5 = sshra.s32 %s180_s27, 4  ;;  %s561_s5 = int_to_ptr.hbm [resolvable:$true] %s560_s5 }
  0x27   : > { %s181_s30 = sshll.u32 %s702_s28, 4  ;;  %s562_s6 = scalar_lea.hbm %s561_s5, 16  ;;  %s182_s30 = int_to_ptr.vmem [resolvable:$true] %s181_s30 }
  0x28   : > { %p563_p7 = scmp.ne.s32.totalorder %s561_s5, %s562_s6  ;;  %s567_s7 = scalar_lea.hbm %s894_s1, 16 }
  0x29   : > { %p569_p3 = scmp.lt.s32.totalorder %s567_s7, %s562_s6 }
  0x2a   : > { %p565_p9 = pnand %p563_p7, %p534_p8 }
  0x2c   : > { %p566_p10 = pneg %p565_p9 }
  0x2e   : > { %p571_p5 = pnand %p569_p3, %p566_p10 }
  0x30   : > { %574 = shalt.err (!%p571_p5)
}
  0x31   : > { %446 = dma.hbm_to_vmem [thread:$0]  (!%p800_p2), %s180_s27, 256, %s182_s30, [#allocation6], %s700_s17, %s700_s17, %s701_s18  }
  0x32   : > { %193 = sbr.rel (%p820_p1) target bundleno = 76 (0x4c), region = 28  ;;  %s195_s8 = sand.u32 (!%p820_p1), 1, %s685_s13  }
  0x33   : > { %s418_s12 = sshll.u32 (!%p820_p1), %s195_s8, 4  ;;  %s196_s22 = scalar_lea.sflag (!%p820_p1), [#allocation3], %s195_s8 }
  0x34   : > { %s199_s23 = scalar_lea.vmem (!%p820_p1), [#allocation2], %s418_s12 }
  0x37   : > { %655 = dma.done.wait (%p771_p6), %s196_s22, 256  }
  0x38   : > { %657 = vsyncadd (%p771_p6), %s196_s22, 4294967040  ;;  %s206_s28 = scalar_lea.sflag [#allocation6], %s195_s8  ;;  %s209_s5 = scalar_lea.vmem [#allocation5], %s418_s12 }
  0x39   : > { %659 = dma.done.wait (%p771_p6), %s206_s28, 256  }
  0x3a   : > { %661 = vsyncadd (%p771_p6), %s206_s28, 4294967040  ;;  %s421_s4 = sshll.u32 %s689_s14, 4  ;;  %v256_v0 = vlaneseq  ;;  %s233_s17 = sand.u32 1, %s673_s10   ;;  %v250_v6 = vld [vmem:[%s209_s5] sm:$0xff]  ;;  %v251_v7 = vld [vmem:[%s209_s5 + $0x8] sm:$0xff]  ;;  %v703_v13 = vmov 0.0  }
  0x3b   : > { %v259_v1 = vstv %s421_s4  ;;  %s420_s18 = sshll.u32 %s233_s17, 4  ;;  %v252_v8 = vld [vmem:[%s199_s23] sm:$0xff]  ;;  %v253_v9 = vld [vmem:[%s199_s23 + $0x8] sm:$0xff]  ;;  %vm264_vm2 = vcmp.ne.f32.partialorder %v250_v6, 0.0  ;;  %vm265_vm3 = vcmp.ne.f32.partialorder %v251_v7, 0.0  ;;  %s299_s20 = scalar_lea.hbm %s895_s2, %s421_s4 }
  0x3c   : > { %v257_v2 = vshrl.u32 %v256_v0, 7  ;;  %v268_v10 = vsub.f32 %v252_v8, %v250_v6  ;;  %v269_v11 = vsub.f32 %v253_v9, %v251_v7  ;;  %s302_s27 = sshll.u32 %s299_s20, 4  ;;  %s235_s30 = scalar_lea.vmem [#allocation7], %s420_s18  ;;  %s303_s27 = int_to_ptr.hbm [resolvable:$true] %s302_s27 }
  0x3d   : > { %s300_s6 = sshll.u32 %s235_s30, 4  ;;  %s288_s29 = scalar_lea.sflag [#allocation4], %s233_s17  ;;  %s301_s6 = int_to_ptr.vmem [resolvable:$true] %s300_s6 }
  0x3e   : > { %v258_v3 = vadd.s32 8, %v257_v2  ;;  %v260_v4 = vadd.s32 %v259_v1, %v257_v2  ;;  %v270_v12 = vand.u32 2147483647, %v268_v10  ;;  %v271_v15 = vand.u32 2147483647, %v269_v11  ;;  %s604_s3 = sshra.s32 %s303_s27, 4  ;;  %s605_s3 = int_to_ptr.hbm [resolvable:$true] %s604_s3 }
  0x3f   : > { %s606_s7 = scalar_lea.hbm %s605_s3, 16  ;;  %s610_s22 = scalar_lea.hbm %s895_s2, 32 }
  0x40   : > { %v261_v5 = vadd.s32 %v259_v1, %v258_v3  ;;  %vm262_vm0 = vcmp.lt.s32.totalorder %v260_v4, 16  ;;  %p607_p6 = scmp.ne.s32.totalorder %s605_s3, %s606_s7  ;;  %p611_p4 = scmp.lt.s32.totalorder %s605_s3, %s895_s2 }
  0x41   : > { %vm266_vm4 = vmand %vm264_vm2, %vm262_vm0  ;;  %p612_p11 = scmp.lt.s32.totalorder %s610_s22, %s606_s7 }
  0x42   : > { %vm263_vm1 = vcmp.lt.s32.totalorder %v261_v5, 16  ;;  %v422_v14 = vsel %vm266_vm4, 1.0, %v703_v13  ;;  %v272_v17 = vsel %vm266_vm4, %v270_v12, 0.0  ;;  %p608_p2 = pnand %p607_p6, %p785_p12 }
  0x43   : > { %vm267_vm5 = vmand %vm265_vm3, %vm263_vm1  ;;  %p613_p1 = por %p612_p11, %p611_p4 }
  0x44   : > { %v423_v16 = vsel %vm267_vm5, 1.0, %v703_v13  ;;  %v273_v19 = vsel %vm267_vm5, %v271_v15, 0.0  ;;  %p609_p8 = pneg %p608_p2 }
  0x45   : > { %v279_v18 = vadd.f32 %v423_v16, %v422_v14  ;;  %v278_v20 = vadd.f32 %v273_v19, %v272_v17 }
  0x46   : > { %p614_p7 = pnand %p613_p1, %p609_p8 }
  0x47   : > { %425 = vst [vmem:[%s235_s30 + $0x8] sm:$0xff] %v279_v18 }
  0x48   : > { %282 = vst [vmem:[%s235_s30] sm:$0xff] %v278_v20 }
  0x49   : > { %617 = shalt.err (!%p614_p7)
}
  0x4a   : > { %s704_s5 = smov 128   ;;  %s705_s4 = smov 8  }
  0x4b   : > { %438 = dma.vmem_to_hbm [thread:$0]  (%p785_p12), %s301_s6, 256, %s303_s27, %s288_s29, %s704_s5, %s704_s5, %s705_s4  }
  0x4c PF: > { %s317_s17 = sand.u32 1, %s669_s9   ;;  %p448_p9 = pnand %p410_p13, %p790_p0 }
  0x4d   : > { %s318_s18 = scalar_lea.sflag [#allocation4], %s317_s17 }
  0x4e   : > { %p449_p10 = pneg %p448_p9 }
  0x50   : > { %663 = dma.done.wait (%p449_p10), %s318_s18, 256  }
  0x51   : > { %665 = vsyncadd (%p449_p10), %s318_s18, 4294967040  ;;  %s21_s16 = sadd.s32 1, %s697_s16   ;;  %s902_s9 = smov %s673_s10 }
  0x52   : > { %p18_p3 = scmp.ge.s32.totalorder %s21_s16, 4   ;;  %s903_s10 = smov %s677_s11 }
  0x53   : > { %s904_s11 = smov %s779_s24  ;;  %s905_s12 = smov %s685_s13 }
  0x54   : > { %s883_s13 = smov 0   ;;  %s906_s14 = smov %s693_s15 }
  0x55   : > { %s907_s15 = smov %s909_s19  ;;  %20 = sbr.rel (!%p18_p3) target bundleno = 9 (0x9), region = 91 }
  0x5a   :  { %324 = vsyncpa [#allocation3], 1 }
  0x5b   :  { %326 = vsyncpa [#allocation3 + $0x1], 1 }
  0x5c   :  { %327 = vsyncpa [#allocation6], 1 }
  0x5d   :  { %329 = vsyncpa [#allocation6 + $0x1], 1 }
  0x5e   :  { %330 = vsyncpa [#allocation4], 1 }
  0x5f   :  { %332 = vsyncpa [#allocation4 + $0x1], 1 }

</bundles_post_ra>
